<compile_context>
chip_gen: v6e
topology: v6e:2x2x1
jax: 0.10.0
libtpu: 0.0.40
codegen_flags: <defaults>
</compile_context>

<pallas_src>
import jax
import jax.numpy as jnp
from jax.experimental import pallas as pl
from jax.experimental.pallas import tpu as pltpu


# ----------------------------------------------------------------------------
# Kernel
# ----------------------------------------------------------------------------
def _make_kernel(num_hidden_layers, fuse, nodes_per_graph, batch_per_chunk,
                 m_tile, compute_dtype, cast_hidden, approx_gate):
    """Kernel over one row tile of one batch chunk.

    Grid = (batch_chunk [parallel], row_tile [arbitrary/reduction]).
    Inputs: x tile [m_tile, D], mask tile [m_tile, 1], weight refs, out [Bc, O].
    """
    L = num_hidden_layers

    def dense(h, w_ref, b_ref, relu):
        y = jnp.dot(h, w_ref[...], preferred_element_type=jnp.float32) + b_ref[...]
        if relu:
            y = jnp.maximum(y, 0.0)
            if cast_hidden:
                y = y.astype(compute_dtype)
        return y

    def kernel(x_ref, mask_ref, *rest):
        w = rest[:-1]          # weight/bias refs
        out_ref = rest[-1]     # [Bc, O] accumulator, resident over the k axis

        @pl.when(pl.program_id(1) == 0)
        def _():
            out_ref[...] = jnp.zeros_like(out_ref)

        x = x_ref[...]                       # [m_tile, D] in compute dtype

        if fuse:
            # Layer 0 fused (shared input), deeper layers block-diagonal,
            # final layer as two zero-extended matmuls (no lane slicing).
            h = x
            for l in range(L):
                h = dense(h, w[2 * l], w[2 * l + 1], relu=True)
            i_out = dense(h, w[2 * L], w[2 * L + 1], relu=False)
            j_out = dense(h, w[2 * L + 2], w[2 * L + 3], relu=False)
        else:
            # Separate chains (large hidden dims): no zero-block FLOP waste.
            hi = x
            hj = x
            for l in range(L):
                hi = dense(hi, w[4 * l], w[4 * l + 1], relu=True)
                hj = dense(hj, w[4 * l + 2], w[4 * l + 3], relu=True)
            i_out = dense(hi, w[4 * L], w[4 * L + 1], relu=False)
            j_out = dense(hj, w[4 * L + 2], w[4 * L + 3], relu=False)

        # Sigmoid gate on the EUP: exp + approx reciprocal (free slot under
        # the MXU/VPU work).  Exact path kept for strict verification.
        if approx_gate:
            gate = pl.reciprocal(1.0 + jnp.exp(-i_out), approx=True)
        else:
            gate = jax.nn.sigmoid(i_out)
        gated = gate * j_out * mask_ref[...]            # f32 [m_tile, O]

        # On-the-fly per-graph one-hot selector for this row tile
        # (replaces the old streamed [B, R_pad] mask matrix).
        base = pl.program_id(1) * m_tile
        col = jax.lax.broadcasted_iota(jnp.int32, (batch_per_chunk, m_tile), 1)
        row = base + col                                 # global row id in chunk
        b_id = jax.lax.broadcasted_iota(jnp.int32, (batch_per_chunk, m_tile), 0)
        lo = b_id * nodes_per_graph
        sel = jnp.logical_and(row >= lo, row < lo + nodes_per_graph)
        sel = sel.astype(jnp.float32)                    # padded rows never match

        # Masked per-graph node sum as a matmul: [Bc, m_tile] @ [m_tile, O].
        out_ref[...] += jnp.dot(sel, gated, preferred_element_type=jnp.float32)

    return kernel


# ----------------------------------------------------------------------------
# Weight packing
# ----------------------------------------------------------------------------
def _fuse_weights(params_i, params_j, compute_dtype):
    """Fused stack: layer 0 concat, deeper layers block-diag,
    final layer as two zero-extended weights (so the kernel never slices)."""
    n_layers = len(params_i) // 2
    L = n_layers - 1
    args = []
    for l in range(L):
        wi, bi = params_i[2 * l], params_i[2 * l + 1]
        wj, bj = params_j[2 * l], params_j[2 * l + 1]
        if l == 0:
            w = jnp.concatenate([wi, wj], axis=1)
        else:
            zi = jnp.zeros((wi.shape[0], wj.shape[1]), wi.dtype)
            zj = jnp.zeros((wj.shape[0], wi.shape[1]), wj.dtype)
            w = jnp.concatenate(
                [jnp.concatenate([wi, zi], axis=1),
                 jnp.concatenate([zj, wj], axis=1)], axis=0)
        b = jnp.concatenate([bi, bj], axis=1)
        args += [w.astype(compute_dtype), b.astype(jnp.float32)]

    wiL, biL = params_i[-2], params_i[-1]
    wjL, bjL = params_j[-2], params_j[-1]
    if L == 0:
        wi_ext, wj_ext = wiL, wjL                       # final acts on x directly
    else:
        wi_ext = jnp.concatenate([wiL, jnp.zeros_like(wjL)], axis=0)
        wj_ext = jnp.concatenate([jnp.zeros_like(wiL), wjL], axis=0)
    args += [wi_ext.astype(compute_dtype), biL.astype(jnp.float32),
             wj_ext.astype(compute_dtype), bjL.astype(jnp.float32)]
    return args


def _split_weights(params_i, params_j, compute_dtype):
    """Un-fused stacks for large hidden dims: (Wi, bi, Wj, bj) per layer."""
    n_layers = len(params_i) // 2
    args = []
    for l in range(n_layers):
        args += [params_i[2 * l].astype(compute_dtype),
                 params_i[2 * l + 1].astype(jnp.float32),
                 params_j[2 * l].astype(compute_dtype),
                 params_j[2 * l + 1].astype(jnp.float32)]
    return args


# ----------------------------------------------------------------------------
# Wrapper
# ----------------------------------------------------------------------------
def graph_level_output(node_states, mask, params_i, params_j, *,
                       compute_dtype=jnp.bfloat16,
                       m_tile=512,
                       batch_chunks=None,
                       fuse_hidden=None,
                       cast_hidden=True,      # set False on v5e (no bf16 VPU)
                       approx_gate=True,      # EUP sigmoid
                       vmem_limit_bytes=None):
    """node_states: [B, N, D], mask: [B, N].

    params_i / params_j: flat tuples (W0, b0, W1, b1, ...) with
      W: [in_dim, out_dim], b: [1, out_dim]  (transpose of nn.Linear layout).
    Returns [B, output_dim] f32.
    """
    B, N, D = node_states.shape
    L = len(params_i) // 2 - 1
    O = params_i[-2].shape[1]
    H = params_i[0].shape[1] if L >= 1 else 0

    if fuse_hidden is None:
        # Block-diag fusion only pays while 2H keeps a single matmul lane-dense.
        fuse_hidden = (L >= 1) and (2 * H <= 256)

    if batch_chunks is None:
        batch_chunks = 2 if B >= 2 else 1     # feed both v7x TensorCores
    C = batch_chunks
    B_pad = pl.cdiv(B, C) * C
    Bc = B_pad // C

    x = node_states
    mk = mask
    if B_pad > B:
        x = jnp.pad(x, ((0, B_pad - B), (0, 0), (0, 0)))
        mk = jnp.pad(mk, ((0, B_pad - B), (0, 0)))

    # Per-chunk row layout; pad rows so tiles never straddle a chunk boundary.
    rows = Bc * N
    m_tile_eff = min(m_tile, pl.cdiv(rows, 8) * 8)      # sublane-aligned
    n_tiles = pl.cdiv(rows, m_tile_eff)
    rows_pad = n_tiles * m_tile_eff

    x = x.reshape(C, rows, D)
    mk = mk.reshape(C, rows)
    if rows_pad > rows:
        x = jnp.pad(x, ((0, 0), (0, rows_pad - rows), (0, 0)))
        mk = jnp.pad(mk, ((0, 0), (0, rows_pad - rows)))   # pad rows -> mask 0
    x = x.astype(compute_dtype)
    mk = mk.astype(jnp.float32)[..., None]               # [C, rows_pad, 1]

    if fuse_hidden:
        w_args = _fuse_weights(params_i, params_j, compute_dtype)
    else:
        w_args = _split_weights(params_i, params_j, compute_dtype)

    in_specs = (
        [pl.BlockSpec((None, m_tile_eff, D), lambda c, k: (c, k, 0)),   # x rows
         pl.BlockSpec((None, m_tile_eff, 1), lambda c, k: (c, k, 0))]   # mask
        + [pl.BlockSpec(p.shape, lambda c, k: (0, 0)) for p in w_args]  # weights
    )
    # Out block index constant over the reduction axis -> VMEM accumulator,
    # written back to HBM once per batch chunk.
    out_specs = pl.BlockSpec((None, Bc, O), lambda c, k: (c, 0, 0))

    kernel = _make_kernel(L, fuse_hidden, N, Bc, m_tile_eff,
                          compute_dtype, cast_hidden, approx_gate)

    cp_kwargs = dict(dimension_semantics=("parallel", "arbitrary"))
    if vmem_limit_bytes is not None:
        cp_kwargs["vmem_limit_bytes"] = vmem_limit_bytes

    out = pl.pallas_call(
        kernel,
        out_shape=jax.ShapeDtypeStruct((C, Bc, O), jnp.float32),
        grid_spec=pltpu.PrefetchScalarGridSpec(
            num_scalar_prefetch=0,
            grid=(C, n_tiles),
            in_specs=in_specs,
            out_specs=out_specs,
        ),
        compiler_params=pltpu.CompilerParams(**cp_kwargs),
    )(x, mk, *w_args)

    return out.reshape(B_pad, O)[:B]


# ----------------------------------------------------------------------------
# Reference + test harness
# ----------------------------------------------------------------------------
def _init_mlp_params(key, input_dim, num_hidden_layers, hidden_dim, output_dim):
    """Deterministic init; weights as [in, out], biases as [1, out]."""
    dims = [input_dim] + [hidden_dim] * num_hidden_layers + [output_dim]
    params = []
    for i in range(len(dims) - 1):
        key, kw, kb = jax.random.split(key, 3)
        scale = 1.0 / jnp.sqrt(jnp.float32(dims[i]))
        w = jax.random.uniform(kw, (dims[i], dims[i + 1]), jnp.float32,
                               minval=-scale, maxval=scale)
        b = jax.random.uniform(kb, (1, dims[i + 1]), jnp.float32,
                               minval=-scale, maxval=scale)
        params += [w, b]
    return tuple(params), key


def _reference(node_states, mask, params_i, params_j):
    """Pure-JAX reference mirroring the PyTorch forward."""
    def mlp(x, params):
        n_layers = len(params) // 2 - 1
        h = x
        for l in range(n_layers):
            h = jnp.maximum(h @ params[2 * l] + params[2 * l + 1], 0.0)
        return h @ params[-2] + params[-1]

    i_out = mlp(node_states, params_i)
    j_out = mlp(node_states, params_j)
    gated = jax.nn.sigmoid(i_out) * j_out * mask[..., None]
    return gated.sum(axis=1)


if __name__ == "__main__":
    key = jax.random.PRNGKey(0)

    # ---- Case 1: small shapes consistent with the module's forward ----------
    B, N, D, H, L, O = 2, 8, 16, 32, 1, 16
    key, k_ns, k_mask = jax.random.split(key, 3)
    node_states = jax.random.normal(k_ns, (B, N, D), jnp.float32)
    mask = (jax.random.uniform(k_mask, (B, N)) > 0.3).astype(jnp.float32)
    params_i, key = _init_mlp_params(key, D, L, H, O)
    params_j, key = _init_mlp_params(key, D, L, H, O)
    ref = _reference(node_states, mask, params_i, params_j)

    # Strict f32 path (exact sigmoid): tight tolerance validates the data path.
    out = graph_level_output(node_states, mask, params_i, params_j,
                             compute_dtype=jnp.float32, approx_gate=False)
    out = jax.block_until_ready(out)
    assert out.shape == (B, O)
    assert jnp.allclose(out, ref, atol=1e-3, rtol=1e-3), (
        f"f32 max abs err {jnp.max(jnp.abs(out - ref))}")

    # Default optimized path: bf16 matmuls, EUP approx sigmoid, 2 batch chunks.
    out = graph_level_output(node_states, mask, params_i, params_j)
    out = jax.block_until_ready(out)
    assert out.shape == (B, O)
    assert jnp.allclose(out, ref, atol=3e-2, rtol=3e-2), (
        f"bf16 max abs err {jnp.max(jnp.abs(out - ref))}")

    # ---- Case 2: odd batch, non-pow2 nodes, 2 hidden layers, multi-tile -----
    # Exercises batch padding, row padding, block-diag fused hidden layer and
    # accumulation across several row tiles per chunk.
    B, N, D, H, L, O = 3, 24, 16, 32, 2, 16
    key, k_ns, k_mask = jax.random.split(key, 3)
    node_states = jax.random.normal(k_ns, (B, N, D), jnp.float32)
    mask = (jax.random.uniform(k_mask, (B, N)) > 0.3).astype(jnp.float32)
    params_i, key = _init_mlp_params(key, D, L, H, O)
    params_j, key = _init_mlp_params(key, D, L, H, O)
    ref = _reference(node_states, mask, params_i, params_j)

    out = graph_level_output(node_states, mask, params_i, params_j,
                             compute_dtype=jnp.float32, approx_gate=False,
                             m_tile=16, batch_chunks=2)
    out = jax.block_until_ready(out)
    assert out.shape == (B, O)
    assert jnp.allclose(out, ref, atol=1e-3, rtol=1e-3), (
        f"case2 fused max abs err {jnp.max(jnp.abs(out - ref))}")

    # Same case through the un-fused (large-hidden) code path, single chunk.
    out = graph_level_output(node_states, mask, params_i, params_j,
                             compute_dtype=jnp.float32, approx_gate=False,
                             fuse_hidden=False, m_tile=16, batch_chunks=1)
    out = jax.block_until_ready(out)
    assert out.shape == (B, O)
    assert jnp.allclose(out, ref, atol=1e-3, rtol=1e-3), (
        f"case2 split max abs err {jnp.max(jnp.abs(out - ref))}")

    print("KERNEL_OK")
</pallas_src>

<mosaic_0001>
module attributes {stable_mosaic.version = 11 : i64} {
  func.func @kernel(%arg0: i32, %arg1: i32, %arg2: memref<1x8x16xf32, #tpu.memory_space<vmem>>, %arg3: memref<1x8x1xf32, #tpu.memory_space<vmem>>, %arg4: memref<16x64xf32, #tpu.memory_space<vmem>>, %arg5: memref<1x64xf32, #tpu.memory_space<vmem>>, %arg6: memref<64x16xf32, #tpu.memory_space<vmem>>, %arg7: memref<1x16xf32, #tpu.memory_space<vmem>>, %arg8: memref<64x16xf32, #tpu.memory_space<vmem>>, %arg9: memref<1x16xf32, #tpu.memory_space<vmem>>, %arg10: memref<1x1x16xf32, #tpu.memory_space<vmem>>) attributes {dimension_semantics = [#tpu.dimension_semantics<parallel>, #tpu.dimension_semantics<arbitrary>], iteration_bounds = array<i64: 2, 1>, scalar_prefetch = 0 : i64, scratch_operands = 0 : i64, tpu.core_type = #tpu.core_type<tc>, window_params = [{transform_indices = @transform_0, window_bounds = array<i64: 1, 8, 16>}, {transform_indices = @transform_1, window_bounds = array<i64: 1, 8, 1>}, {pipeline_mode = #tpu.pipeline_mode<synchronous>, transform_indices = @transform_2, window_bounds = array<i64: 16, 64>}, {pipeline_mode = #tpu.pipeline_mode<synchronous>, transform_indices = @transform_3, window_bounds = array<i64: 1, 64>}, {pipeline_mode = #tpu.pipeline_mode<synchronous>, transform_indices = @transform_4, window_bounds = array<i64: 64, 16>}, {pipeline_mode = #tpu.pipeline_mode<synchronous>, transform_indices = @transform_5, window_bounds = array<i64: 1, 16>}, {pipeline_mode = #tpu.pipeline_mode<synchronous>, transform_indices = @transform_6, window_bounds = array<i64: 64, 16>}, {pipeline_mode = #tpu.pipeline_mode<synchronous>, transform_indices = @transform_7, window_bounds = array<i64: 1, 16>}, {transform_indices = @transform_8, window_bounds = array<i64: 1, 1, 16>}]} {
    %c0_i32 = arith.constant 0 : i32
    %0 = arith.cmpi eq, %arg1, %c0_i32 : i32
    %1 = arith.extui %0 : i1 to i32
    %c0_i32_0 = arith.constant 0 : i32
    %2 = arith.cmpi ne, %1, %c0_i32_0 : i32
    scf.if %2 {
      %cst_31 = arith.constant 0.000000e+00 : f32
      %53 = vector.broadcast %cst_31 : f32 to vector<1x16xf32>
      %c0_32 = arith.constant 0 : index
      %c0_33 = arith.constant 0 : index
      %c0_34 = arith.constant 0 : index
      %54 = vector.load %arg10[%c0_32, %c0_33, %c0_34] : memref<1x1x16xf32, #tpu.memory_space<vmem>>, vector<1x1x16xf32>
      %55 = vector.shape_cast %54 : vector<1x1x16xf32> to vector<1x16xf32>
      %56 = vector.shape_cast %53 : vector<1x16xf32> to vector<1x1x16xf32>
      tpu.vector_store %arg10[%c0_32, %c0_33, %c0_34], %56 {strides = array<i32>} : memref<1x1x16xf32, #tpu.memory_space<vmem>>, vector<1x1x16xf32>,
    } else {
    }
    %c0 = arith.constant 0 : index
    %c0_1 = arith.constant 0 : index
    %c0_2 = arith.constant 0 : index
    %3 = vector.load %arg2[%c0, %c0_1, %c0_2] : memref<1x8x16xf32, #tpu.memory_space<vmem>>, vector<1x8x16xf32>
    %4 = vector.shape_cast %3 : vector<1x8x16xf32> to vector<8x16xf32>
    %c0_3 = arith.constant 0 : index
    %c0_4 = arith.constant 0 : index
    %5 = vector.load %arg4[%c0_3, %c0_4] : memref<16x64xf32, #tpu.memory_space<vmem>>, vector<16x64xf32>
    %cst = arith.constant dense<0.000000e+00> : vector<8x64xf32>
    %6 = tpu.matmul %4, %5, %cst {dimension_numbers = #tpu.dot_dimension_numbers<[1], [0], [0], [1], [0, 0, 1, 1], [], []>} : vector<8x16xf32>, vector<16x64xf32>, vector<8x64xf32> -> vector<8x64xf32>
    %c0_5 = arith.constant 0 : index
    %c0_6 = arith.constant 0 : index
    %7 = vector.load %arg5[%c0_5, %c0_6] : memref<1x64xf32, #tpu.memory_space<vmem>>, vector<1x64xf32>
    %8 = vector.broadcast %7 : vector<1x64xf32> to vector<8x64xf32>
    %9 = arith.addf %6, %8 : vector<8x64xf32>
    %cst_7 = arith.constant 0.000000e+00 : f32
    %10 = vector.broadcast %cst_7 : f32 to vector<8x64xf32>
    %11 = arith.maximumf %9, %10 : vector<8x64xf32>
    %c0_8 = arith.constant 0 : index
    %c0_9 = arith.constant 0 : index
    %12 = vector.load %arg6[%c0_8, %c0_9] : memref<64x16xf32, #tpu.memory_space<vmem>>, vector<64x16xf32>
    %cst_10 = arith.constant dense<0.000000e+00> : vector<8x16xf32>
    %13 = tpu.matmul %11, %12, %cst_10 {dimension_numbers = #tpu.dot_dimension_numbers<[1], [0], [0], [1], [0, 0, 1, 1], [], []>} : vector<8x64xf32>, vector<64x16xf32>, vector<8x16xf32> -> vector<8x16xf32>
    %c0_11 = arith.constant 0 : index
    %c0_12 = arith.constant 0 : index
    %14 = vector.load %arg7[%c0_11, %c0_12] : memref<1x16xf32, #tpu.memory_space<vmem>>, vector<1x16xf32>
    %15 = vector.broadcast %14 : vector<1x16xf32> to vector<8x16xf32>
    %16 = arith.addf %13, %15 : vector<8x16xf32>
    %c0_13 = arith.constant 0 : index
    %c0_14 = arith.constant 0 : index
    %17 = vector.load %arg8[%c0_13, %c0_14] : memref<64x16xf32, #tpu.memory_space<vmem>>, vector<64x16xf32>
    %cst_15 = arith.constant dense<0.000000e+00> : vector<8x16xf32>
    %18 = tpu.matmul %11, %17, %cst_15 {dimension_numbers = #tpu.dot_dimension_numbers<[1], [0], [0], [1], [0, 0, 1, 1], [], []>} : vector<8x64xf32>, vector<64x16xf32>, vector<8x16xf32> -> vector<8x16xf32>
    %c0_16 = arith.constant 0 : index
    %c0_17 = arith.constant 0 : index
    %19 = vector.load %arg9[%c0_16, %c0_17] : memref<1x16xf32, #tpu.memory_space<vmem>>, vector<1x16xf32>
    %20 = vector.broadcast %19 : vector<1x16xf32> to vector<8x16xf32>
    %21 = arith.addf %18, %20 : vector<8x16xf32>
    %22 = arith.negf %16 : vector<8x16xf32>
    %23 = math.exp %22 : vector<8x16xf32>
    %cst_18 = arith.constant 1.000000e+00 : f32
    %24 = vector.broadcast %cst_18 : f32 to vector<8x16xf32>
    %25 = arith.addf %24, %23 : vector<8x16xf32>
    %26 = arith.divf %24, %25 : vector<8x16xf32>
    %27 = arith.mulf %26, %21 : vector<8x16xf32>
    %c0_19 = arith.constant 0 : index
    %c0_20 = arith.constant 0 : index
    %c0_21 = arith.constant 0 : index
    %28 = vector.load %arg3[%c0_19, %c0_20, %c0_21] : memref<1x8x1xf32, #tpu.memory_space<vmem>>, vector<1x8x1xf32>
    %29 = vector.shape_cast %28 : vector<1x8x1xf32> to vector<8x1xf32>
    %30 = vector.broadcast %29 : vector<8x1xf32> to vector<8x16xf32>
    %31 = arith.mulf %27, %30 : vector<8x16xf32>
    %c8_i32 = arith.constant 8 : i32
    %32 = arith.muli %arg1, %c8_i32 : i32
    %33 = tpu.iota {dimensions = array<i32: 1>} : vector<1x8xi32>
    %34 = vector.broadcast %32 : i32 to vector<1x8xi32>
    %35 = arith.addi %34, %33 : vector<1x8xi32>
    %36 = tpu.iota {dimensions = array<i32: 0>} : vector<1x8xi32>
    %c8_i32_22 = arith.constant 8 : i32
    %37 = vector.broadcast %c8_i32_22 : i32 to vector<1x8xi32>
    %38 = arith.muli %36, %37 : vector<1x8xi32>
    %39 = arith.cmpi sge, %35, %38 : vector<1x8xi32>
    %c8_i32_23 = arith.constant 8 : i32
    %40 = vector.broadcast %c8_i32_23 : i32 to vector<1x8xi32>
    %41 = arith.addi %38, %40 : vector<1x8xi32>
    %42 = arith.cmpi slt, %35, %41 : vector<1x8xi32>
    %43 = arith.andi %39, %42 : vector<1x8xi1>
    %44 = arith.extui %43 : vector<1x8xi1> to vector<1x8xi32>
    %45 = arith.sitofp %44 : vector<1x8xi32> to vector<1x8xf32>
    %c0_24 = arith.constant 0 : index
    %c0_25 = arith.constant 0 : index
    %c0_26 = arith.constant 0 : index
    %46 = vector.load %arg10[%c0_24, %c0_25, %c0_26] : memref<1x1x16xf32, #tpu.memory_space<vmem>>, vector<1x1x16xf32>
    %47 = vector.shape_cast %46 : vector<1x1x16xf32> to vector<1x16xf32>
    %cst_27 = arith.constant dense<0.000000e+00> : vector<1x16xf32>
    %48 = tpu.matmul %45, %31, %cst_27 {dimension_numbers = #tpu.dot_dimension_numbers<[1], [0], [0], [1], [0, 0, 1, 1], [], []>} : vector<1x8xf32>, vector<8x16xf32>, vector<1x16xf32> -> vector<1x16xf32>
    %49 = arith.addf %47, %48 : vector<1x16xf32>
    %c0_28 = arith.constant 0 : index
    %c0_29 = arith.constant 0 : index
    %c0_30 = arith.constant 0 : index
    %50 = vector.load %arg10[%c0_28, %c0_29, %c0_30] : memref<1x1x16xf32, #tpu.memory_space<vmem>>, vector<1x1x16xf32>
    %51 = vector.shape_cast %50 : vector<1x1x16xf32> to vector<1x16xf32>
    %52 = vector.shape_cast %49 : vector<1x16xf32> to vector<1x1x16xf32>
    tpu.vector_store %arg10[%c0_28, %c0_29, %c0_30], %52 {strides = array<i32>} : memref<1x1x16xf32, #tpu.memory_space<vmem>>, vector<1x1x16xf32>,
    return
  }
  func.func @transform_0(%arg0: i32, %arg1: i32) -> (i32, i32, i32) {
    %c0_i32 = arith.constant 0 : i32
    %c0_i32_0 = arith.constant 0 : i32
    return %arg0, %arg1, %c0_i32 : i32, i32, i32
  }
  func.func @transform_1(%arg0: i32, %arg1: i32) -> (i32, i32, i32) {
    %c0_i32 = arith.constant 0 : i32
    %c0_i32_0 = arith.constant 0 : i32
    return %arg0, %arg1, %c0_i32 : i32, i32, i32
  }
  func.func @transform_2(%arg0: i32, %arg1: i32) -> (i32, i32) {
    %c0_i32 = arith.constant 0 : i32
    %c0_i32_0 = arith.constant 0 : i32
    %c0_i32_1 = arith.constant 0 : i32
    return %c0_i32, %c0_i32_0 : i32, i32
  }
  func.func @transform_3(%arg0: i32, %arg1: i32) -> (i32, i32) {
    %c0_i32 = arith.constant 0 : i32
    %c0_i32_0 = arith.constant 0 : i32
    %c0_i32_1 = arith.constant 0 : i32
    return %c0_i32, %c0_i32_0 : i32, i32
  }
  func.func @transform_4(%arg0: i32, %arg1: i32) -> (i32, i32) {
    %c0_i32 = arith.constant 0 : i32
    %c0_i32_0 = arith.constant 0 : i32
    %c0_i32_1 = arith.constant 0 : i32
    return %c0_i32, %c0_i32_0 : i32, i32
  }
  func.func @transform_5(%arg0: i32, %arg1: i32) -> (i32, i32) {
    %c0_i32 = arith.constant 0 : i32
    %c0_i32_0 = arith.constant 0 : i32
    %c0_i32_1 = arith.constant 0 : i32
    return %c0_i32, %c0_i32_0 : i32, i32
  }
  func.func @transform_6(%arg0: i32, %arg1: i32) -> (i32, i32) {
    %c0_i32 = arith.constant 0 : i32
    %c0_i32_0 = arith.constant 0 : i32
    %c0_i32_1 = arith.constant 0 : i32
    return %c0_i32, %c0_i32_0 : i32, i32
  }
  func.func @transform_7(%arg0: i32, %arg1: i32) -> (i32, i32) {
    %c0_i32 = arith.constant 0 : i32
    %c0_i32_0 = arith.constant 0 : i32
    %c0_i32_1 = arith.constant 0 : i32
    return %c0_i32, %c0_i32_0 : i32, i32
  }
  func.func @transform_8(%arg0: i32, %arg1: i32) -> (i32, i32, i32) {
    %c0_i32 = arith.constant 0 : i32
    %c0_i32_0 = arith.constant 0 : i32
    %c0_i32_1 = arith.constant 0 : i32
    return %arg0, %c0_i32, %c0_i32_0 : i32, i32, i32
  }
}

</mosaic_0001>

<bundles_post_ra>
// kernel: tpu_custom_call.1
= control target key start
LH: loop header
LB: loop body
LE: loop exit
PB: predicated region body
PF: predicated region fallthrough
CT: control target
= control target key end

     0   :  { %13 = vsyncpa [#allocation3], 0  ;;  %s1317_s0 = inlined_call_operand.vmem [shape: f32[2,8,16], index: 0, kind: input, shape index: {}]   ;;  %s1318_s1 = inlined_call_operand.vmem [shape: f32[2,8,1], index: 1, kind: input, shape index: {}]   ;;  %s1319_s2 = inlined_call_operand.vmem [shape: f32[16,64], index: 2, kind: input, shape index: {}]   ;;  %s1320_s3 = inlined_call_operand.vmem [shape: f32[1,64], index: 3, kind: input, shape index: {}]   ;;  %s1321_s4 = inlined_call_operand.vmem [shape: f32[64,16], index: 4, kind: input, shape index: {}]   ;;  %s1322_s5 = inlined_call_operand.vmem [shape: f32[1,16], index: 5, kind: input, shape index: {}]   ;;  %s1323_s6 = inlined_call_operand.vmem [shape: f32[64,16], index: 6, kind: input, shape index: {}]   ;;  %s1324_s7 = inlined_call_operand.vmem [shape: f32[1,16], index: 7, kind: input, shape index: {}]   ;;  %s1325_s8 = inlined_call_operand.hbm [shape: f32[2,1,16], index: 8, kind: output, shape index: {}]  }
   0x1   :  { %15 = vsyncpa [#allocation3 + $0x1], 0  ;;  %s1098_s27 = smov 0   ;;  %s1100_s28 = smov 0  }
   0x2   :  { %s1102_s29 = smov 0   ;;  %s1104_s30 = smov 0  }
   0x3   :  { %s1106_s9 = smov 0   ;;  %s1108_s10 = smov 0  }
   0x4 LB: > { %s816_s11 = sadd.s32 4294967295, %s1047_s10   ;;  %s817_s12 = sadd.s32 4294967294, %s1047_s10   ;;  %s1047_s10 = sphi %s1108_s10, %s21_s10   ;;  %s1043_s9 = sphi %s1106_s9, %s1332_s9   ;;  %s1039_s30 = sphi %s1104_s30, %s1331_s30   ;;  %s1035_s29 = sphi %s1102_s29, %s1330_s29   ;;  %s1031_s28 = sphi %s1100_s28, %s1329_s28   ;;  %s1027_s27 = sphi %s1098_s27, %s1328_s27  }
   0x5   : > { %s33_s13 = sadd.s32 1, %s1043_s9  ;;  %s222_s14 = sadd.s32 1, %s1035_s29 }
   0x6   : > { %p35_p0 = scmp.ge.s32.totalorder %s33_s13, 2  ;;  %p232_p1 = scmp.ne.s32.totalorder %s1035_s29, %s1031_s28 }
   0x7   : > { %p233_p2 = scmp.eq.s32.totalorder %s816_s11, 1  ;;  %p238_p3 = scmp.ne.s32.totalorder %s1031_s28, %s1027_s27 }
   0x8   : > { %s1334_s13 = smov (%p35_p0, %s33_s13), 0  ;;  %p239_p5 = scmp.eq.s32.totalorder %s817_s12, 1 }
   0x9   : > { %p1138_p4 = por %p233_p2, %p232_p1  ;;  %s219_s16 = ssub.s32 %s1043_s9, %s1334_s13 }
   0xa   : > { %p820_p6 = scmp.ge.s32.totalorder %s1047_s10, 1  ;;  %p220_p7 = scmp.eq.s32.totalorder %s219_s16, 0 }
   0xb   : > { %p1145_p8 = por %p239_p5, %p238_p3  ;;  %p295_p9 = scmp.lt.s32.totalorder %s1047_s10, 3 }
   0xc   : > { %s1151_s18 = scalar_select %p220_p7, %s1035_s29, %s222_s14  }
   0xd   : > { %p296_p10 = pnand %p820_p6, %p295_p9 }
   0xe   : > { %p337_p11 = scmp.lt.s32.totalorder (!%p296_p10), %s1039_s30, 1  ;;  %s832_s14 = sshll.u32 (!%p296_p10), %s1039_s30, 4 }
   0xf   : > { %299 = sbr.rel (%p296_p10) target bundleno = 664 (0x298), region = 52 }
  0x14   : > { %v359_v0 = vld [vmem:[%s1319_s2 + $0x8] sm:$0xff]  ;;  %v1049_v1 = vmov 0.0   ;;  %v358_v2 = vld [vmem:[%s1319_s2] sm:$0xff]  ;;  %vm1050_vm0 = vmmov 0   ;;  %v449_v3 = vld [vmem:[%s1321_s4 + $0x38] sm:$0xff]  ;;  %s1167_s25 = scalar_select %p337_p11, %s1039_s30, 1  ;;  %v631_v34 = vlaneseq }
  0x15   : > { %858 = vmatprep.subr.mxu0 %v1049_v1  ;;  %862 = vmatprep.mubr.msk.f32.mxu0 %vm1050_vm0, %v1049_v1  ;;  %v448_v4 = vld [vmem:[%s1321_s4 + $0x30] sm:$0xff]  ;;  %vm367_vm1 = vcmask 130048   ;;  %v447_v5 = vld [vmem:[%s1321_s4 + $0x28] sm:$0xff]  ;;  %v538_v6 = vld [vmem:[%s1323_s6 + $0x38] sm:$0xff]  ;;  %v1051_v20 = vmov 0   ;;  %vm457_vm2 = vcmask 523264  }
  0x16   : > { %859 = vmatpush3.msra.mxu0 %v359_v0  ;;  %865 = vmatprep.subr.mxu1 %v1049_v1  ;;  %s821_s12 = sshll.u32 %s1167_s25, 3  ;;  %v446_v8 = vld [vmem:[%s1321_s4 + $0x20] sm:$0xff]  ;;  %v537_v9 = vld [vmem:[%s1323_s6 + $0x30] sm:$0xff]  ;;  %v445_v10 = vld [vmem:[%s1321_s4 + $0x18] sm:$0xff]  ;;  %s335_s25 = sand.u32 1, %s1031_s28   ;;  %vm355_vm3 = vcmask 122880  }
  0x17   : > { %860 = vmatprep.subr.mxu0 %v1049_v1  ;;  %866 = vmatpush3.msra.mxu1 %v449_v3  ;;  %s343_s21 = scalar_lea.vmem %s1317_s0, %s821_s12  ;;  %v536_v11 = vld [vmem:[%s1323_s6 + $0x28] sm:$0xff]  ;;  %v535_v12 = vld [vmem:[%s1323_s6 + $0x20] sm:$0xff]  ;;  %v534_v13 = vld [vmem:[%s1323_s6 + $0x18] sm:$0xff]  ;;  %s350_s20 = scalar_lea.vmem %s1318_s1, %s821_s12  ;;  %v636_v37 = vshrl.u32 %v631_v34, 7  ;;  %v632_v39 = vand.u32 127, %v631_v34  ;;  %vm645_vm7 = vcmask 64512  }
  0x18   : > { %861 = vmatpush3.msra.mxu0 %v358_v2  ;;  %867 = vmatprep.subr.mxu1 %v1049_v1  ;;  %v357_v7 = vld [vmem:[%s343_s21] sm:$0xff]  ;;  %v444_v14 = vld [vmem:[%s1321_s4 + $0x10] sm:$0xff]  ;;  %v443_v16 = vld [vmem:[%s1321_s4 + $0x8] sm:$0xff]  ;;  %s1255_s12 = scalar_lea.vmem [#allocation2], %s335_s25  ;;  %s1273_s21 = scalar_lea.hbm %s1325_s8, %s832_s14 }
  0x19   : > { %884 = vmatprep.subr.mxu0 %v1049_v1  ;;  %868 = vmatpush3.msra.mxu1 %v448_v4  ;;  %v533_v15 = vld [vmem:[%s1323_s6 + $0x10] sm:$0xff]  ;;  %v532_v17 = vld [vmem:[%s1323_s6 + $0x8] sm:$0xff]  ;;  %v442_v18 = vld [vmem:[%s1321_s4] sm:$0xff]  ;;  %356 = vst.msk [vmem:[%s1255_s12] sm:$0x1] %vm355_vm3, %v1049_v1  ;;  %v637_v38 = vmul.u32 8, %v636_v37 }
  0x1a   : > { %869 = vmatprep.subr.mxu1 %v1049_v1  ;;  %881 = vmatprep.mubr.msk.f32.mxu1 %vm1050_vm0, %v1049_v1  ;;  %v531_v19 = vld [vmem:[%s1323_s6] sm:$0xff]  ;;  %s735_s16 = sshll.u32 %s1255_s12, 4  ;;  %s723_s22 = scalar_lea.sflag [#allocation3], %s335_s25  ;;  %s736_s16 = int_to_ptr.vmem [resolvable:$true] %s735_s16 }
  0x1b   : > { %863 = vmatmul.mubr.msk.f32.vlgmr.msra.gmra.mxu0 %vm367_vm1, %v357_v7  ;;  %870 = vmatpush3.msra.mxu1 %v447_v5  ;;  %v623_v21 = vld [vmem:[%s350_s20] sm:$0xff]  ;;  %v639_v40 = vadd.s32 8, %v637_v38  ;;  %vm638_vm4 = vcmp.ge.s32.totalorder %v632_v39, %v637_v38  ;;  %s971_s23 = scalar_lea.vmem %s736_s16, 16  ;;  %s1052_s30 = smov [#allocation2]  }
  0x1c   : > { %885 = vmatpush3.msra.mxu0 %v538_v6  ;;  %871 = vmatprep.subr.mxu1 %v1049_v1  ;;  %v823_v22 = vld [vmem:[%s1320_s3] ss:$0 sm:$0xff]  ;;  %p972_p12 = scmp.ne.s32.totalorder %s736_s16, %s971_s23  ;;  %s975_s24 = sshll.u32 %s1052_s30, 4  ;;  %s976_s24 = int_to_ptr.vmem [resolvable:$false] %s975_s24 }
  0x1d   : > { %886 = vmatprep.subr.mxu0 %v1049_v1  ;;  %872 = vmatpush3.msra.mxu1 %v446_v8  ;;  %v825_v27 = vld [vmem:[%s1322_s5] ss:$0 sm:$0xff]  ;;  %vm640_vm5 = vcmp.lt.s32.totalorder %v632_v39, %v639_v40  ;;  %s977_s26 = scalar_lea.vmem %s976_s24, 32  ;;  %p978_p1 = scmp.lt.s32.totalorder %s736_s16, %s976_s24 }
  0x1e   : > { %887 = vmatpush3.msra.mxu0 %v537_v9  ;;  %873 = vmatprep.subr.mxu1 %v1049_v1  ;;  %v827_v41 = vld [vmem:[%s1324_s7] ss:$0 sm:$0xff]  ;;  %vm641_vm6 = vmand %vm638_vm4, %vm640_vm5  ;;  %p973_p13 = pnand %p972_p12, %p1138_p4  ;;  %p979_p2 = scmp.lt.s32.totalorder %s977_s26, %s971_s23 }
  0x1f   : > { %888 = vmatprep.subr.mxu0 %v1049_v1  ;;  %874 = vmatpush3.msra.mxu1 %v445_v10  ;;  %v830_v47 = vsel %vm641_vm6, 1.0, %v1049_v1 }
  0x20   : > { %889 = vmatpush3.msra.mxu0 %v536_v11  ;;  %875 = vmatprep.subr.mxu1 %v1049_v1  ;;  %v644_v48 = vld [vmem:[%s1255_s12] sm:$0x1]  ;;  %p974_p0 = pneg %p973_p13  ;;  %p980_p3 = por %p979_p2, %p978_p1 }
  0x21   : > { %890 = vmatprep.subr.mxu0 %v1049_v1  ;;  %900 = vmatprep.mubr.msk.f32.mxu0 %vm1050_vm0, %v1049_v1 }
  0x22   : > { %891 = vmatpush3.msra.mxu0 %v535_v12  ;;  %876 = vmatpush3.msra.mxu1 %v444_v14  ;;  %p981_p5 = pnand %p980_p3, %p974_p0 }
  0x23   : > { %892 = vmatprep.subr.mxu0 %v1049_v1  ;;  %877 = vmatprep.subr.mxu1 %v1049_v1 }
  0x24   : > { %893 = vmatpush3.msra.mxu0 %v534_v13  ;;  %878 = vmatpush3.msra.mxu1 %v443_v16 }
  0x25   : > { %894 = vmatprep.subr.mxu0 %v1049_v1  ;;  %879 = vmatprep.subr.mxu1 %v1049_v1 }
  0x26   : > { %895 = vmatpush3.msra.mxu0 %v533_v15  ;;  %880 = vmatpush3.msra.mxu1 %v442_v18 }
  0x27   : > { %896 = vmatprep.subr.mxu0 %v1049_v1  ;;  %903 = vmatprep.subr.mxu1 %v1049_v1 }
  0x28   : > { %897 = vmatpush3.msra.mxu0 %v532_v17  ;;  %966 = vset.pattern.permute.xlu0 %v1051_v20 }
  0x29   : > { %898 = vmatprep.subr.mxu0 %v1049_v1  ;;  %626 = vperm.xlu0 %966, %v623_v21  }
  0x2a   : > { %899 = vmatpush3.msra.mxu0 %v531_v19 }
  0xa4   : > { %v627_v44 = vpop.permute.xlu0 %626 }
  0xdb   : > { %v437_v23 = vpop.f32.mrf.mxu0 }
  0xdc   : > { %v438_v24 = vadd.f32 %v823_v22, %v437_v23 }
  0xdd   : > { %v864_v25 = vpop.f32.mrf.mxu0 }
  0xde   : > { %v441_v26 = vmax.f32 %v438_v24, 0.0 }
  0xe0   : > { %882 = vmatmul.mubr.msk.f32.vlgmr.msra.gmra.mxu1 %vm457_vm2, %v441_v26  ;;  %901 = vmatmul.mubr.msk.f32.vlgmr.msra.gmra.mxu0 %vm457_vm2, %v441_v26 }
  0xe1   : > { %905 = vmatprep.mubr.msk.f32.mxu1 %vm1050_vm0, %v1049_v1 }
 0x1a0   : > { %v527_v28 = vpop.f32.mrf.mxu1  ;;  %v612_v29 = vpop.f32.mrf.mxu0 }
 0x1a1   : > { %v528_v30 = vadd.f32 %v825_v27, %v527_v28  ;;  %v613_v42 = vadd.f32 %v827_v41, %v612_v29 }
 0x1a2   : > { %v883_v31 = vpop.f32.mrf.mxu1  ;;  %v902_v32 = vpop.f32.mrf.mxu0 }
 0x1a3   : > { %v829_v33 = vmul.f32 -1.442695, %v528_v30 }
 0x1a5   : > { %967 = vpow2.f32 %v829_v33 }
 0x1b2   : > { %v968_v35 = vpop.eup %967 }
 0x1b3   : > { %v619_v36 = vadd.f32 1.0, %v968_v35 }
 0x1b5   : > { %969 = vrcp.f32 %v619_v36 }
 0x1c2   : > { %v970_v43 = vpop.eup %969 }
 0x1c3   : > { %v622_v45 = vmul.f32 %v970_v43, %v613_v42 }
 0x1c5   : > { %v629_v46 = vmul.f32 %v627_v44, %v622_v45 }
 0x1c7   : > { %904 = vmatpush3.msra.mxu1 %v629_v46 }
 0x1c8   : > { %906 = vmatmul.mubr.msk.f32.vlgmr.msra.gmra.mxu1 %vm645_vm7, %v830_v47 }
 0x288   : > { %v715_v49 = vpop.f32.mrf.mxu1 }
 0x289   : > { %v719_v50 = vadd.f32 %v715_v49, %v644_v48 }
 0x28a   : > { %v907_v51 = vpop.f32.mrf.mxu1 }
 0x28b   : > { %721 = vst.msk [vmem:[%s1255_s12] sm:$0x1] %vm355_vm3, %v719_v50 }
 0x28c   : > { %984 = shalt.err (!%p981_p5)
}
 0x28d   : > { %s985_s12 = scalar_lea.hbm %s1273_s21, 16  ;;  %s989_s14 = scalar_lea.hbm %s1325_s8, 32 }
 0x28e   : > { %p986_p6 = scmp.ne.s32.totalorder %s1273_s21, %s985_s12  ;;  %p990_p10 = scmp.lt.s32.totalorder %s1273_s21, %s1325_s8 }
 0x28f   : > { %p991_p11 = scmp.lt.s32.totalorder %s989_s14, %s985_s12 }
 0x290   : > { %p987_p7 = pnand %p986_p6, %p1138_p4 }
 0x291   : > { %p992_p12 = por %p991_p11, %p990_p10 }
 0x292   : > { %p988_p9 = pneg %p987_p7 }
 0x294   : > { %p993_p13 = pnand %p992_p12, %p988_p9 }
 0x296   : > { %996 = shalt.err (!%p993_p13)
}
 0x297   : > { %908 = dma.vmem_to_hbm [thread:$0]  (%p1138_p4), %s736_s16, 16, %s1273_s21, %s723_s22  }
 0x298 PF: > { %p914_p0 = scmp.ge.s32.totalorder %s1047_s10, 2  ;;  %s747_s23 = sand.u32 1, %s1027_s27  }
 0x299   : > { %s748_s30 = scalar_lea.sflag [#allocation3], %s747_s23 }
 0x29a   : > { %p911_p1 = pnand %p914_p0, %p1145_p8 }
 0x29c   : > { %p912_p2 = pneg %p911_p1 }
 0x29e   : > { %1022 = dma.done.wait (%p912_p2), %s748_s30, 16  }
 0x29f   : > { %1024 = vsyncadd (%p912_p2), %s748_s30, 4294967280  ;;  %s21_s10 = sadd.s32 1, %s1047_s10   ;;  %s1328_s27 = smov %s1031_s28 }
 0x2a0   : > { %p18_p3 = scmp.ge.s32.totalorder %s21_s10, 4   ;;  %s1329_s28 = smov %s1035_s29 }
 0x2a1   : > { %s1330_s29 = smov %s1151_s18  ;;  %s1331_s30 = smov %s1043_s9 }
 0x2a2   : > { %s1332_s9 = smov %s1334_s13  ;;  %20 = sbr.rel (!%p18_p3) target bundleno = 4 (0x4), region = 94 }
 0x2a7   :  { %752 = vsyncpa [#allocation3], 1 }
 0x2a8   :  { %754 = vsyncpa [#allocation3 + $0x1], 1 }

</bundles_post_ra>
